<compile_context>
chip_gen: v5e
topology: v5e:2x2
jax: 0.10.0
libtpu: 0.0.40
codegen_flags: <defaults>
</compile_context>

<pallas_src>
import functools
import math

import jax
import jax.numpy as jnp
from jax import lax
from jax.experimental import pallas as pl
from jax.experimental.pallas import tpu as pltpu


# ---------------------------------------------------------------------------
# helpers
# ---------------------------------------------------------------------------
def _row_tile(n_rows: int, cap: int = 1024) -> int:
    """Largest row-tile: full extent if small, else a big divisor (multiple of 8)."""
    if n_rows <= cap:
        return n_rows
    for cand in (1024, 512, 256, 128, 64, 32, 16, 8):
        if cand <= cap and n_rows % cand == 0:
            return cand
    return n_rows  # fallback: single full block


# ---------------------------------------------------------------------------
# Kernel 1: linear projection  y = x @ W + b   (rows tiled, lane-dense D)
# ---------------------------------------------------------------------------
def _linear_kernel(x_ref, w_ref, b_ref, o_ref):
    acc = jnp.dot(x_ref[...], w_ref[...], preferred_element_type=jnp.float32)
    acc = acc + b_ref[...].astype(jnp.float32)
    o_ref[...] = acc.astype(o_ref.dtype)


def _linear(x2d, w, b):
    n_rows, d_in = x2d.shape
    d_out = w.shape[1]
    tile = _row_tile(n_rows)
    return pl.pallas_call(
        _linear_kernel,
        out_shape=jax.ShapeDtypeStruct((n_rows, d_out), x2d.dtype),
        grid=(n_rows // tile,),
        in_specs=[
            pl.BlockSpec((tile, d_in), lambda i: (i, 0)),
            pl.BlockSpec((d_in, d_out), lambda i: (0, 0)),
            pl.BlockSpec((1, d_out), lambda i: (0, 0)),
        ],
        out_specs=pl.BlockSpec((tile, d_out), lambda i: (i, 0)),
        compiler_params=pltpu.CompilerParams(dimension_semantics=("parallel",)),
    )(x2d, w, b)


# ---------------------------------------------------------------------------
# Kernel 2: scaled dot-product attention core (grid over batch, heads in-kernel)
# ---------------------------------------------------------------------------
def _make_attention_kernel(num_heads: int, scale: float, has_mask: bool):
    def kernel(*refs):
        if has_mask:
            q_ref, k_ref, v_ref, m_ref, o_ref = refs
        else:
            q_ref, k_ref, v_ref, o_ref = refs
            m_ref = None

        q = q_ref[0].astype(jnp.float32)        # (Sq, D)
        k = k_ref[0].astype(jnp.float32)        # (Sk, D)
        v = v_ref[0].astype(jnp.float32)        # (Sk, D)
        d_k = q.shape[-1] // num_heads
        if m_ref is not None:
            m = m_ref[0]                        # (Sq, Sk)

        head_outs = []
        for h in range(num_heads):              # static unroll over heads
            lo = h * d_k
            qh = q[:, lo:lo + d_k]              # (Sq, d_k)
            kh = k[:, lo:lo + d_k]              # (Sk, d_k)
            vh = v[:, lo:lo + d_k]              # (Sk, d_k)
            # scores = qh @ kh^T : contract d_k axes, no explicit transpose
            s = lax.dot_general(qh, kh, (((1,), (1,)), ((), ())),
                                preferred_element_type=jnp.float32)
            s = s * jnp.float32(scale)
            if m_ref is not None:
                s = jnp.where(m == 0, jnp.float32(-1e9), s)
            s = s - jnp.max(s, axis=-1, keepdims=True)
            p = jnp.exp(s)
            p = p / jnp.sum(p, axis=-1, keepdims=True)
            # TODO(synk): training-mode dropout on attention weights is identity
            # here (eval forward); return_attention=True output is not emitted.
            head_outs.append(jnp.dot(p, vh, preferred_element_type=jnp.float32))

        ctx = jnp.concatenate(head_outs, axis=-1)      # (Sq, D) lane-dense
        o_ref[...] = ctx[None, :, :].astype(o_ref.dtype)

    return kernel


def _attention(q, k, v, mask, *, num_heads):
    batch, s_q, d_model = q.shape
    s_k = k.shape[1]
    scale = 1.0 / math.sqrt(d_model // num_heads)
    kernel = _make_attention_kernel(num_heads, scale, mask is not None)

    in_specs = [
        pl.BlockSpec((1, s_q, d_model), lambda b: (b, 0, 0)),
        pl.BlockSpec((1, s_k, d_model), lambda b: (b, 0, 0)),
        pl.BlockSpec((1, s_k, d_model), lambda b: (b, 0, 0)),
    ]
    inputs = [q, k, v]
    if mask is not None:
        in_specs.append(pl.BlockSpec((1, s_q, s_k), lambda b: (b, 0, 0)))
        inputs.append(mask)

    return pl.pallas_call(
        kernel,
        out_shape=jax.ShapeDtypeStruct((batch, s_q, d_model), q.dtype),
        grid=(batch,),
        in_specs=in_specs,
        out_specs=pl.BlockSpec((1, s_q, d_model), lambda b: (b, 0, 0)),
        compiler_params=pltpu.CompilerParams(dimension_semantics=("parallel",)),
    )(*inputs)


# ---------------------------------------------------------------------------
# Kernel 3: fused output projection + residual add + LayerNorm (torch semantics)
# ---------------------------------------------------------------------------
def _oproj_res_ln_kernel(ctx_ref, res_ref, w_ref, b_ref, g_ref, beta_ref, o_ref, *, eps):
    y = jnp.dot(ctx_ref[...], w_ref[...], preferred_element_type=jnp.float32)
    y = y + b_ref[...].astype(jnp.float32)
    # dropout(output) is identity in eval mode
    y = y + res_ref[...].astype(jnp.float32)
    d = y.shape[-1]
    mean = jnp.mean(y, axis=-1, keepdims=True)
    diff = y - mean
    var = jnp.sum(diff * diff, axis=-1, keepdims=True) * jnp.float32(1.0 / (d - 1))
    std = jnp.sqrt(var)                               # torch unbiased std
    y_norm = diff / (std + jnp.float32(eps))          # (x - mean) / (std + eps)
    out = y_norm * g_ref[...].astype(jnp.float32) + beta_ref[...].astype(jnp.float32)
    o_ref[...] = out.astype(o_ref.dtype)


def _oproj_residual_layernorm(ctx2d, res2d, wo, bo, gamma, beta, *, eps):
    n_rows, d_model = ctx2d.shape
    tile = _row_tile(n_rows)
    kernel = functools.partial(_oproj_res_ln_kernel, eps=eps)
    return pl.pallas_call(
        kernel,
        out_shape=jax.ShapeDtypeStruct((n_rows, d_model), ctx2d.dtype),
        grid=(n_rows // tile,),
        in_specs=[
            pl.BlockSpec((tile, d_model), lambda i: (i, 0)),
            pl.BlockSpec((tile, d_model), lambda i: (i, 0)),
            pl.BlockSpec((d_model, d_model), lambda i: (0, 0)),
            pl.BlockSpec((1, d_model), lambda i: (0, 0)),
            pl.BlockSpec((1, d_model), lambda i: (0, 0)),
            pl.BlockSpec((1, d_model), lambda i: (0, 0)),
        ],
        out_specs=pl.BlockSpec((tile, d_model), lambda i: (i, 0)),
        compiler_params=pltpu.CompilerParams(dimension_semantics=("parallel",)),
    )(ctx2d, res2d, wo, bo, gamma, beta)


# ---------------------------------------------------------------------------
# Full forward (equivalent of MultiHeadAttention.forward, eval mode)
# ---------------------------------------------------------------------------
def multi_head_attention_forward(params, query, key, value, mask=None, *,
                                 num_heads, eps=1e-6, dropout_p=0.1, training=False):
    """query/key/value: (B, Sq, D) / (B, Sk, D) / (B, Sk, D). mask: (B, Sq, Sk) or None."""
    del dropout_p, training  # TODO(synk): training-mode dropout not emitted (eval forward)
    batch, s_q, d_model = query.shape
    s_k = key.shape[1]
    assert d_model % num_heads == 0, "d_model must be divisible by num_heads"
    dt = query.dtype

    # cast parameters to the activation dtype once in the wrapper
    wq, bq = params["wq"].astype(dt), params["bq"].astype(dt)
    wk, bk = params["wk"].astype(dt), params["bk"].astype(dt)
    wv, bv = params["wv"].astype(dt), params["bv"].astype(dt)
    wo, bo = params["wo"].astype(dt), params["bo"].astype(dt)
    gamma, beta = params["gamma"].astype(dt), params["beta"].astype(dt)

    # q/k/v projections over flattened, lane-dense 2-D layouts
    q2 = _linear(query.reshape(batch * s_q, d_model), wq, bq)
    k2 = _linear(key.reshape(batch * s_k, d_model), wk, bk)
    v2 = _linear(value.reshape(batch * s_k, d_model), wv, bv)

    ctx = _attention(q2.reshape(batch, s_q, d_model),
                     k2.reshape(batch, s_k, d_model),
                     v2.reshape(batch, s_k, d_model),
                     mask, num_heads=num_heads)

    out2 = _oproj_residual_layernorm(ctx.reshape(batch * s_q, d_model),
                                     query.reshape(batch * s_q, d_model),
                                     wo, bo, gamma, beta, eps=eps)
    return out2.reshape(batch, s_q, d_model)


# ---------------------------------------------------------------------------
# Pure-JAX reference (mirrors the torch module, eval mode)
# ---------------------------------------------------------------------------
def _reference(params, query, key, value, mask, *, num_heads, eps=1e-6):
    hi = jax.lax.Precision.HIGHEST
    batch, s_q, d_model = query.shape
    d_k = d_model // num_heads

    q = jnp.dot(query, params["wq"], precision=hi) + params["bq"]
    k = jnp.dot(key, params["wk"], precision=hi) + params["bk"]
    v = jnp.dot(value, params["wv"], precision=hi) + params["bv"]

    def split(x):
        b, s, _ = x.shape
        return x.reshape(b, s, num_heads, d_k).transpose(0, 2, 1, 3)

    qh, kh, vh = split(q), split(k), split(v)
    scores = jnp.einsum("bhqd,bhkd->bhqk", qh, kh, precision=hi) / math.sqrt(d_k)
    if mask is not None:
        scores = jnp.where(mask[:, None, :, :] == 0, -1e9, scores)
    attn = jax.nn.softmax(scores, axis=-1)
    ctx = jnp.einsum("bhqk,bhkd->bhqd", attn, vh, precision=hi)
    ctx = ctx.transpose(0, 2, 1, 3).reshape(batch, s_q, d_model)

    out = jnp.dot(ctx, params["wo"], precision=hi) + params["bo"]
    out = query + out
    mean = out.mean(-1, keepdims=True)
    std = jnp.sqrt(((out - mean) ** 2).sum(-1, keepdims=True) / (d_model - 1))
    x_norm = (out - mean) / (std + eps)
    return x_norm * params["gamma"] + params["beta"]


# ---------------------------------------------------------------------------
# Demo / check
# ---------------------------------------------------------------------------
if __name__ == "__main__":
    B, S, D, H = 2, 8, 32, 4

    root = jax.random.PRNGKey(0)
    ks = jax.random.split(root, 16)
    query = jax.random.normal(ks[0], (B, S, D), jnp.float32)
    key_t = jax.random.normal(ks[1], (B, S, D), jnp.float32)
    value = jax.random.normal(ks[2], (B, S, D), jnp.float32)
    mask = (jax.random.uniform(ks[3], (B, S, S)) > 0.3).astype(jnp.int32)

    limit = 1.0 / math.sqrt(D)

    def _lin_init(kw, kb):
        w = jax.random.uniform(kw, (D, D), jnp.float32, -limit, limit)
        b = jax.random.uniform(kb, (1, D), jnp.float32, -limit, limit)
        return w, b

    wq, bq = _lin_init(ks[4], ks[5])
    wk, bk = _lin_init(ks[6], ks[7])
    wv, bv = _lin_init(ks[8], ks[9])
    wo, bo = _lin_init(ks[10], ks[11])
    params = dict(wq=wq, bq=bq, wk=wk, bk=bk, wv=wv, bv=bv, wo=wo, bo=bo,
                  gamma=jnp.ones((1, D), jnp.float32),
                  beta=jnp.zeros((1, D), jnp.float32))

    # no-mask path
    out = multi_head_attention_forward(params, query, key_t, value, None, num_heads=H)
    out = jax.block_until_ready(out)
    ref = _reference(params, query, key_t, value, None, num_heads=H)
    assert out.shape == (B, S, D) and out.dtype == query.dtype
    assert jnp.allclose(out, ref, atol=1e-2, rtol=1e-2)

    # masked path
    out_m = multi_head_attention_forward(params, query, key_t, value, mask, num_heads=H)
    out_m = jax.block_until_ready(out_m)
    ref_m = _reference(params, query, key_t, value, mask, num_heads=H)
    assert jnp.allclose(out_m, ref_m, atol=1e-2, rtol=1e-2)

    print("KERNEL_OK")
</pallas_src>

<mosaic_0001>
module attributes {stable_mosaic.version = 11 : i64} {
  func.func @_linear_kernel(%arg0: i32, %arg1: memref<16x32xf32, #tpu.memory_space<vmem>>, %arg2: memref<32x32xf32, #tpu.memory_space<vmem>>, %arg3: memref<1x32xf32, #tpu.memory_space<vmem>>, %arg4: memref<16x32xf32, #tpu.memory_space<vmem>>) attributes {dimension_semantics = [#tpu.dimension_semantics<parallel>], iteration_bounds = array<i64: 1>, scalar_prefetch = 0 : i64, scratch_operands = 0 : i64, tpu.core_type = #tpu.core_type<tc>, window_params = [{transform_indices = @transform_0, window_bounds = array<i64: 16, 32>}, {pipeline_mode = #tpu.pipeline_mode<synchronous>, transform_indices = @transform_1, window_bounds = array<i64: 32, 32>}, {pipeline_mode = #tpu.pipeline_mode<synchronous>, transform_indices = @transform_2, window_bounds = array<i64: 1, 32>}, {transform_indices = @transform_3, window_bounds = array<i64: 16, 32>}]} {
    %c0 = arith.constant 0 : index
    %c0_0 = arith.constant 0 : index
    %0 = vector.load %arg1[%c0, %c0_0] : memref<16x32xf32, #tpu.memory_space<vmem>>, vector<16x32xf32>
    %c0_1 = arith.constant 0 : index
    %c0_2 = arith.constant 0 : index
    %1 = vector.load %arg2[%c0_1, %c0_2] : memref<32x32xf32, #tpu.memory_space<vmem>>, vector<32x32xf32>
    %cst = arith.constant dense<0.000000e+00> : vector<16x32xf32>
    %2 = tpu.matmul %0, %1, %cst {dimension_numbers = #tpu.dot_dimension_numbers<[1], [0], [0], [1], [0, 0, 1, 1], [], []>} : vector<16x32xf32>, vector<32x32xf32>, vector<16x32xf32> -> vector<16x32xf32>
    %c0_3 = arith.constant 0 : index
    %c0_4 = arith.constant 0 : index
    %3 = vector.load %arg3[%c0_3, %c0_4] : memref<1x32xf32, #tpu.memory_space<vmem>>, vector<1x32xf32>
    %4 = vector.broadcast %3 : vector<1x32xf32> to vector<16x32xf32>
    %5 = arith.addf %2, %4 : vector<16x32xf32>
    %c0_5 = arith.constant 0 : index
    %c0_6 = arith.constant 0 : index
    %6 = vector.load %arg4[%c0_5, %c0_6] : memref<16x32xf32, #tpu.memory_space<vmem>>, vector<16x32xf32>
    tpu.vector_store %arg4[%c0_5, %c0_6], %5 {strides = array<i32>} : memref<16x32xf32, #tpu.memory_space<vmem>>, vector<16x32xf32>,
    return
  }
  func.func @transform_0(%arg0: i32) -> (i32, i32) {
    %c0_i32 = arith.constant 0 : i32
    %c0_i32_0 = arith.constant 0 : i32
    return %arg0, %c0_i32 : i32, i32
  }
  func.func @transform_1(%arg0: i32) -> (i32, i32) {
    %c0_i32 = arith.constant 0 : i32
    %c0_i32_0 = arith.constant 0 : i32
    %c0_i32_1 = arith.constant 0 : i32
    return %c0_i32, %c0_i32_0 : i32, i32
  }
  func.func @transform_2(%arg0: i32) -> (i32, i32) {
    %c0_i32 = arith.constant 0 : i32
    %c0_i32_0 = arith.constant 0 : i32
    %c0_i32_1 = arith.constant 0 : i32
    return %c0_i32, %c0_i32_0 : i32, i32
  }
  func.func @transform_3(%arg0: i32) -> (i32, i32) {
    %c0_i32 = arith.constant 0 : i32
    %c0_i32_0 = arith.constant 0 : i32
    return %arg0, %c0_i32 : i32, i32
  }
}

</mosaic_0001>

<bundles_post_ra>
// kernel: tpu_custom_call.1
= control target key start
LH: loop header
LB: loop body
LE: loop exit
PB: predicated region body
PF: predicated region fallthrough
CT: control target
= control target key end

     0   :  { %8 = vsyncpa [#allocation3], 0  ;;  %s249_s0 = inlined_call_operand.hbm [shape: f32[16,32], index: 0, kind: input, shape index: {}]   ;;  %s250_s1 = inlined_call_operand.hbm [shape: f32[32,32], index: 1, kind: input, shape index: {}]   ;;  %s251_s2 = inlined_call_operand.vmem [shape: f32[1,32], index: 2, kind: input, shape index: {}]   ;;  %s252_s3 = inlined_call_operand.hbm [shape: f32[16,32], index: 3, kind: output, shape index: {}]  }
   0x1   :  { %9 = vsyncpa [#allocation6], 0 }
   0x2   :  { %10 = vsyncpa [#allocation4], 0  ;;  %s15_s14 = sshll.u32 %s249_s0, 4  ;;  %s199_s15 = smov [#allocation2]   ;;  %s16_s14 = int_to_ptr.hbm [resolvable:$true] %s15_s14 }
   0x3   :  { %s17_s16 = sshll.u32 %s199_s15, 4  ;;  %s28_s19 = sshll.u32 %s250_s1, 4  ;;  %s18_s16 = int_to_ptr.vmem [resolvable:$true] %s17_s16  ;;  %s29_s19 = int_to_ptr.hbm [resolvable:$true] %s28_s19 }
   0x4   :  { %s200_s20 = smov 128   ;;  %s201_s21 = smov 8  }
   0x5   :  { %23 = dma.hbm_to_vmem [thread:$0]  %s16_s14, 256, %s18_s16, [#allocation3], %s200_s20, %s200_s20, %s201_s21  }
   0x6   :  { %s202_s22 = smov [#allocation5]  }
   0x7   :  { %s30_s23 = sshll.u32 %s202_s22, 4  ;;  %s31_s23 = int_to_ptr.vmem [resolvable:$true] %s30_s23 }
   0x8   :  { %36 = dma.hbm_to_vmem [thread:$0]  %s29_s19, 512, %s31_s23, [#allocation6], %s200_s20, %s200_s20, %s201_s21  }
   0x9   :  { %193 = dma.done.wait [#allocation3], 256  }
   0xa   :  { %194 = vsyncadd [#allocation3], 4294967040 }
   0xb   :  { %195 = dma.done.wait [#allocation6], 512  }
   0xc   :  { %196 = vsyncadd [#allocation6], 4294966784  ;;  %v52_v0 = vld [vmem:[#allocation5 + $0x18] sm:$0xff]  ;;  %v51_v1 = vld [vmem:[#allocation5 + $0x10] sm:$0xff]  ;;  %vm57_vm0 = vcmask 261120   ;;  %s203_s24 = smov [#allocation7]  }
   0xd   :  { %76 = vmatpush.msra.mxu0 %v52_v0  ;;  %111 = vmatpush.msra.mxu1 %v52_v0  ;;  %v50_v2 = vld [vmem:[#allocation5 + $0x8] sm:$0xff]  ;;  %v49_v3 = vld [vmem:[#allocation5] sm:$0xff]  ;;  %v47_v4 = vld [vmem:[#allocation2] sm:$0xff]  ;;  %s93_s25 = sshll.u32 %s203_s24, 4  ;;  %s95_s28 = sshll.u32 %s252_s3, 4  ;;  %s94_s25 = int_to_ptr.vmem [resolvable:$true] %s93_s25  ;;  %s96_s28 = int_to_ptr.hbm [resolvable:$true] %s95_s28 }
   0xe   :  { %v48_v5 = vld [vmem:[#allocation2 + $0x8] sm:$0xff]  ;;  %v120_v6 = vld [vmem:[%s251_s2] ss:$0 sm:$0xff] }
   0xf   :  { %77 = vmatpush.msra.mxu0 %v51_v1  ;;  %112 = vmatpush.msra.mxu1 %v51_v1 }
  0x11   :  { %78 = vmatpush.msra.mxu0 %v50_v2  ;;  %113 = vmatpush.msra.mxu1 %v50_v2 }
  0x13   :  { %79 = vmatpush.msra.mxu0 %v49_v3  ;;  %114 = vmatpush.msra.mxu1 %v49_v3 }
  0x14   :  { %109 = vmatmul.msk.f32.vlgmr.msra.gmra.mxu0 %vm57_vm0, %v47_v4  ;;  %110 = vmatmul.msk.f32.vlgmr.msra.gmra.mxu1 %vm57_vm0, %v48_v5 }
  0x91   :  { %v81_v7 = vpop.f32.mrf.mxu0  ;;  %v84_v8 = vpop.f32.mrf.mxu1 }
  0x92   :  { %v82_v9 = vadd.f32 %v120_v6, %v81_v7  ;;  %v85_v10 = vadd.f32 %v120_v6, %v84_v8 }
  0x94   :  { %87 = vst.msk [vmem:[#allocation7] sm:$0xff] %vm57_vm0, %v82_v9 }
  0x95   :  { %88 = vst.msk [vmem:[#allocation7 + $0x8] sm:$0xff] %vm57_vm0, %v85_v10 }
  0x96   :  { %101 = dma.vmem_to_hbm [thread:$0]  %s94_s25, 256, %s96_s28, [#allocation4], %s200_s20, %s200_s20, %s201_s21  }
  0x97   :  { %197 = dma.done.wait [#allocation4], 256  }
  0x98   :  { %198 = vsyncadd [#allocation4], 4294967040 }
  0x99   :  { %106 = vsyncpa [#allocation3], 1 }
  0x9a   :  { %107 = vsyncpa [#allocation6], 1 }
  0x9b   :  { %108 = vsyncpa [#allocation4], 1 }

</bundles_post_ra>
